<compile_context>
chip_gen: v6e
topology: v6e:2x2x1
jax: 0.10.0
libtpu: 0.0.40
codegen_flags: <defaults>
</compile_context>

<pallas_src>
import functools

import jax
import jax.numpy as jnp
from jax.experimental import pallas as pl
from jax.experimental.pallas import tpu as pltpu


_ROW_CAP = 2048  # max tb*tt rows per grid step -> (tb*tt, Fp=512) f32 slab <= 4 MiB


def _bf16_elementwise_ok():
    """bf16 VPU/EUP exists on v6e/v7x; v5e and older only have f32 elementwise."""
    try:
        kind = jax.devices()[0].device_kind.lower()
    except Exception:
        return False
    return not any(v in kind for v in ("v2", "v3", "v4", "v5"))


def _finetune_kernel(x_ref, w_enc_ref, b_enc_ref, w_cls_ref, b_cls_ref,
                     pooled_ref, logits_ref, *, bf16_tanh):
    # Grid = (B_tiles, T_tiles); T is the last ("arbitrary") reduction axis.
    #   x_ref:      (tb, tt, D_in)  f32 encoder-input tile (cast to bf16 in-kernel)
    #   w_enc_ref:  (D_in, Fp)      bf16, resident across the grid
    #   b_enc_ref:  (1, Fp)         f32
    #   w_cls_ref:  (Fp, Cp)        f32, resident
    #   b_cls_ref:  (1, Cp)         f32
    #   pooled_ref: (tb, Fp)        f32 output; ALSO the running-sum accumulator
    #                               (block index constant across T -> VMEM-resident)
    #   logits_ref: (tb, Cp)        f32 output (written on the last T step only)
    t = pl.program_id(1)

    @pl.when(t == 0)
    def _():
        pooled_ref[...] = jnp.zeros_like(pooled_ref)

    tb, tt, d_in = x_ref.shape

    # Encoder hot path: cast the f32 tile to bf16 on the VALU (no extra HBM pass in
    # the wrapper), one lane-dense MXU matmul with f32 accumulation, bias in f32.
    x2d = x_ref[...].reshape(tb * tt, d_in).astype(jnp.bfloat16)
    pre = jnp.dot(x2d, w_enc_ref[...],
                  preferred_element_type=jnp.float32) + b_enc_ref[...]

    # tanh dominates the elementwise phase (one per B*T*Fp element). bf16 on the EUP
    # is ~2x on v6e/v7x; v5e has no bf16 EUP so it stays f32 there.
    if bf16_tanh:
        feats = jnp.tanh(pre.astype(jnp.bfloat16))        # (tb*tt, Fp) bf16
    else:
        feats = jnp.tanh(pre)                             # (tb*tt, Fp) f32

    # torch.mean(features, dim=1): per-tile token-sum (f32 accumulation) added into
    # the resident pooled output block across the T grid axis.  No pooling matrix,
    # no extra scratch buffer.
    pooled_ref[...] += jnp.sum(feats.reshape(tb, tt, -1), axis=1, dtype=jnp.float32)

    @pl.when(t == pl.num_programs(1) - 1)
    def _():
        total_t = tt * pl.num_programs(1)
        pooled = pooled_ref[...] * (1.0 / total_t)         # (tb, Fp) f32
        pooled_ref[...] = pooled
        # Classifier: tiny matmul, kept f32 for precision.
        logits_ref[...] = (
            jnp.dot(pooled, w_cls_ref[...], preferred_element_type=jnp.float32)
            + b_cls_ref[...]
        )


def _largest_divisor(n, cap, multiple):
    """Largest divisor of n that is <= cap and a multiple of `multiple` (or None)."""
    best = None
    d = multiple
    top = min(n, cap)
    while d <= top:
        if n % d == 0:
            best = d
        d += multiple
    return best


def finetune_forward(x, w_enc, b_enc, w_cls, b_cls, *, bf16_tanh=None):
    """x: (B, T, D_in); w_enc: (D_in, F); b_enc: (1, F); w_cls: (F, C); b_cls: (1, C).
    Returns (pooled (B, F) f32, logits (B, C) f32)."""
    if bf16_tanh is None:
        bf16_tanh = _bf16_elementwise_ok()

    B, T, D_in = x.shape
    F = w_enc.shape[1]
    C = w_cls.shape[1]

    # Lane/sublane-dense padding.  Zero-padded encoder COLUMNS give pre=0 -> tanh(0)=0
    # features, so padded Fp/Cp columns contribute exactly 0 to pooled/logits.
    # Zero-padded BATCH rows do produce tanh(b_enc) != 0 features, so padded rows are
    # only correct because they are sliced off below -- keep that slice.
    Fp = pl.cdiv(F, 128) * 128          # 400 -> 512
    Cp = pl.cdiv(C, 128) * 128          # 10  -> 128
    Bp = pl.cdiv(B, 8) * 8              # 2   -> 8

    # x stays f32 in HBM (cast to bf16 inside the kernel).  Weight casts are tiny
    # one-time ops (hoist out of the per-call path if they are static in your setup).
    xp = jnp.pad(x.astype(jnp.float32), ((0, Bp - B), (0, 0), (0, 0)))
    w_enc_p = jnp.pad(w_enc, ((0, 0), (0, Fp - F))).astype(jnp.bfloat16)
    b_enc_p = jnp.pad(b_enc.reshape(1, F), ((0, 0), (0, Fp - F))).astype(jnp.float32)
    w_cls_p = jnp.pad(w_cls, ((0, Fp - F), (0, Cp - C))).astype(jnp.float32)
    b_cls_p = jnp.pad(b_cls.reshape(1, C), ((0, 0), (0, Cp - C))).astype(jnp.float32)

    # --- Tile selection -------------------------------------------------------
    # tb: batch rows per block.  Cap at Bp//2 once Bp >= 16 so the "parallel" batch
    # axis has >= 2 programs and both v7x TensorCores get work.
    tb_cap = min(Bp, 128)
    if Bp >= 16:
        tb_cap = min(tb_cap, Bp // 2)
    tb = _largest_divisor(Bp, tb_cap, 8) or Bp   # Bp is a multiple of 8 -> always found

    # tt: tokens per block; tb*tt bounded by _ROW_CAP so the f32 feats slab stays small.
    tt_cap = max(8, _ROW_CAP // tb)
    tt = _largest_divisor(T, tt_cap, 8)
    if tt is None:
        tt = T                                    # full-dim block is always legal
    assert Bp % tb == 0 and T % tt == 0, (Bp, tb, T, tt)
    nb, nt = Bp // tb, T // tt

    # --- VMEM budget (drives vmem_limit_bytes, generation-agnostic) ------------
    lane = 128
    d_in_lanes = pl.cdiv(D_in, lane) * lane
    x_tile_bytes = tb * tt * d_in_lanes * 4                       # f32, lane-padded
    feat_bytes = 2 if bf16_tanh else 4
    inter_bytes = tb * tt * (d_in_lanes * 2 + Fp * (4 + feat_bytes))
    w_bytes = 2 * (D_in * Fp * 2 + Fp * 4 + Fp * Cp * 4 + Cp * 4)  # double-buffered
    out_bytes = 2 * (tb * Fp * 4 + tb * Cp * 4)
    budget = 2 * x_tile_bytes + inter_bytes + w_bytes + out_bytes + (4 << 20)
    vmem_limit = int(min(max(budget, 32 << 20), 96 << 20))

    cost = pl.CostEstimate(
        flops=int(2 * Bp * T * D_in * Fp + 2 * Bp * Fp * Cp),
        transcendentals=int(Bp * T * Fp),
        bytes_accessed=int(xp.size * 4 + w_enc_p.size * 2 + b_enc_p.size * 4
                           + w_cls_p.size * 4 + b_cls_p.size * 4
                           + Bp * Fp * 4 + Bp * Cp * 4),
    )

    grid_spec = pltpu.PrefetchScalarGridSpec(
        num_scalar_prefetch=0,
        grid=(nb, nt),                                        # reduction axis last
        in_specs=[
            pl.BlockSpec((tb, tt, D_in), lambda b, t: (b, t, 0)),
            pl.BlockSpec((D_in, Fp), lambda b, t: (0, 0)),    # resident weights
            pl.BlockSpec((1, Fp), lambda b, t: (0, 0)),
            pl.BlockSpec((Fp, Cp), lambda b, t: (0, 0)),
            pl.BlockSpec((1, Cp), lambda b, t: (0, 0)),
        ],
        out_specs=(
            pl.BlockSpec((tb, Fp), lambda b, t: (b, 0)),
            pl.BlockSpec((tb, Cp), lambda b, t: (b, 0)),
        ),
        scratch_shapes=[],
    )

    pooled_p, logits_p = pl.pallas_call(
        functools.partial(_finetune_kernel, bf16_tanh=bf16_tanh),
        out_shape=(
            jax.ShapeDtypeStruct((Bp, Fp), jnp.float32),
            jax.ShapeDtypeStruct((Bp, Cp), jnp.float32),
        ),
        grid_spec=grid_spec,
        compiler_params=pltpu.CompilerParams(
            dimension_semantics=("parallel", "arbitrary"),
            vmem_limit_bytes=vmem_limit),
        cost_estimate=cost,
    )(xp, w_enc_p, b_enc_p, w_cls_p, b_cls_p)

    return pooled_p[:B, :F], logits_p[:B, :C]


if __name__ == "__main__":
    B, T, D_in, F, C = 2, 8, 32, 400, 10

    key = jax.random.PRNGKey(0)
    kx, k1, k2, k3, k4 = jax.random.split(key, 5)

    x     = jax.random.normal(kx, (B, T, D_in), jnp.float32)
    w_enc = jax.random.normal(k1, (D_in, F), jnp.float32) * 0.05
    b_enc = jax.random.normal(k2, (1, F),    jnp.float32) * 0.01
    w_cls = jax.random.normal(k3, (F, C),    jnp.float32) * 0.05
    b_cls = jax.random.normal(k4, (1, C),    jnp.float32) * 0.01

    bf16_tanh = _bf16_elementwise_ok()
    pooled, logits = jax.block_until_ready(
        finetune_forward(x, w_enc, b_enc, w_cls, b_cls, bf16_tanh=bf16_tanh)
    )
    assert pooled.shape == (B, F) and logits.shape == (B, C)

    # Reference replicating the kernel's mixed-precision math.
    x_bf = x.reshape(B * T, D_in).astype(jnp.bfloat16)
    w_bf = w_enc.astype(jnp.bfloat16)
    pre_ref = jnp.dot(x_bf, w_bf, preferred_element_type=jnp.float32) + b_enc
    feats_ref = jnp.tanh(pre_ref.astype(jnp.bfloat16) if bf16_tanh else pre_ref)
    feats_ref = feats_ref.astype(jnp.float32).reshape(B, T, F)
    pooled_ref = jnp.mean(feats_ref, axis=1)
    logits_ref = pooled_ref @ w_cls + b_cls
    assert jnp.allclose(pooled, pooled_ref, atol=2e-3, rtol=2e-3), \
        float(jnp.max(jnp.abs(pooled - pooled_ref)))
    assert jnp.allclose(logits, logits_ref, atol=2e-3, rtol=2e-3), \
        float(jnp.max(jnp.abs(logits - logits_ref)))

    # Loose check against the pure-f32 math of the original module.
    feats32 = jnp.tanh(x.reshape(B * T, D_in) @ w_enc + b_enc).reshape(B, T, F)
    pooled32 = jnp.mean(feats32, axis=1)
    logits32 = pooled32 @ w_cls + b_cls
    assert jnp.allclose(pooled, pooled32, atol=3e-2)
    assert jnp.allclose(logits, logits32, atol=3e-2)

    print("KERNEL_OK")
</pallas_src>

<mosaic_0001>
module attributes {stable_mosaic.version = 11 : i64} {
  func.func @_finetune_kernel(%arg0: i32, %arg1: i32, %arg2: memref<8x8x32xf32, #tpu.memory_space<vmem>>, %arg3: memref<32x512xbf16, #tpu.memory_space<vmem>>, %arg4: memref<1x512xf32, #tpu.memory_space<vmem>>, %arg5: memref<512x128xf32, #tpu.memory_space<vmem>>, %arg6: memref<1x128xf32, #tpu.memory_space<vmem>>, %arg7: memref<8x512xf32, #tpu.memory_space<vmem>>, %arg8: memref<8x128xf32, #tpu.memory_space<vmem>>) attributes {dimension_semantics = [#tpu.dimension_semantics<parallel>, #tpu.dimension_semantics<arbitrary>], iteration_bounds = array<i64: 1, 1>, scalar_prefetch = 0 : i64, scratch_operands = 0 : i64, tpu.core_type = #tpu.core_type<tc>, window_params = [{transform_indices = @transform_0, window_bounds = array<i64: 8, 8, 32>}, {pipeline_mode = #tpu.pipeline_mode<synchronous>, transform_indices = @transform_1, window_bounds = array<i64: 32, 512>}, {pipeline_mode = #tpu.pipeline_mode<synchronous>, transform_indices = @transform_2, window_bounds = array<i64: 1, 512>}, {pipeline_mode = #tpu.pipeline_mode<synchronous>, transform_indices = @transform_3, window_bounds = array<i64: 512, 128>}, {pipeline_mode = #tpu.pipeline_mode<synchronous>, transform_indices = @transform_4, window_bounds = array<i64: 1, 128>}, {transform_indices = @transform_5, window_bounds = array<i64: 8, 512>}, {transform_indices = @transform_6, window_bounds = array<i64: 8, 128>}]} {
    %c0_i32 = arith.constant 0 : i32
    %0 = arith.cmpi eq, %arg1, %c0_i32 : i32
    %1 = arith.extui %0 : i1 to i32
    %c0_i32_0 = arith.constant 0 : i32
    %2 = arith.cmpi ne, %1, %c0_i32_0 : i32
    scf.if %2 {
      %cst_14 = arith.constant 0.000000e+00 : f32
      %22 = vector.broadcast %cst_14 : f32 to vector<8x512xf32>
      %c0_15 = arith.constant 0 : index
      %c0_16 = arith.constant 0 : index
      %23 = vector.load %arg7[%c0_15, %c0_16] : memref<8x512xf32, #tpu.memory_space<vmem>>, vector<8x512xf32>
      tpu.vector_store %arg7[%c0_15, %c0_16], %22 {strides = array<i32>} : memref<8x512xf32, #tpu.memory_space<vmem>>, vector<8x512xf32>,
    } else {
    }
    %c0 = arith.constant 0 : index
    %c0_1 = arith.constant 0 : index
    %c0_2 = arith.constant 0 : index
    %3 = vector.load %arg2[%c0, %c0_1, %c0_2] : memref<8x8x32xf32, #tpu.memory_space<vmem>>, vector<8x8x32xf32>
    %4 = vector.shape_cast %3 : vector<8x8x32xf32> to vector<64x32xf32>
    %5 = arith.truncf %4 : vector<64x32xf32> to vector<64x32xbf16>
    %c0_3 = arith.constant 0 : index
    %c0_4 = arith.constant 0 : index
    %6 = vector.load %arg3[%c0_3, %c0_4] : memref<32x512xbf16, #tpu.memory_space<vmem>>, vector<32x512xbf16>
    %cst = arith.constant dense<0.000000e+00> : vector<64x512xf32>
    %7 = tpu.matmul %5, %6, %cst {dimension_numbers = #tpu.dot_dimension_numbers<[1], [0], [0], [1], [0, 0, 1, 1], [], []>} : vector<64x32xbf16>, vector<32x512xbf16>, vector<64x512xf32> -> vector<64x512xf32>
    %c0_5 = arith.constant 0 : index
    %c0_6 = arith.constant 0 : index
    %8 = vector.load %arg4[%c0_5, %c0_6] : memref<1x512xf32, #tpu.memory_space<vmem>>, vector<1x512xf32>
    %9 = vector.broadcast %8 : vector<1x512xf32> to vector<64x512xf32>
    %10 = arith.addf %7, %9 : vector<64x512xf32>
    %11 = arith.truncf %10 : vector<64x512xf32> to vector<64x512xbf16>
    %12 = math.tanh %11 : vector<64x512xbf16>
    %c0_7 = arith.constant 0 : index
    %c0_8 = arith.constant 0 : index
    %13 = vector.load %arg7[%c0_7, %c0_8] : memref<8x512xf32, #tpu.memory_space<vmem>>, vector<8x512xf32>
    %14 = vector.shape_cast %12 : vector<64x512xbf16> to vector<8x8x512xbf16>
    %15 = arith.extf %14 : vector<8x8x512xbf16> to vector<8x8x512xf32>
    %cst_9 = arith.constant dense<0.000000e+00> : vector<8x512xf32>
    %16 = vector.multi_reduction <add>, %15, %cst_9 [1] : vector<8x8x512xf32> to vector<8x512xf32>
    %17 = arith.addf %13, %16 : vector<8x512xf32>
    %c0_10 = arith.constant 0 : index
    %c0_11 = arith.constant 0 : index
    %18 = vector.load %arg7[%c0_10, %c0_11] : memref<8x512xf32, #tpu.memory_space<vmem>>, vector<8x512xf32>
    tpu.vector_store %arg7[%c0_10, %c0_11], %17 {strides = array<i32>} : memref<8x512xf32, #tpu.memory_space<vmem>>, vector<8x512xf32>,
    %c0_i32_12 = arith.constant 0 : i32
    %19 = arith.cmpi eq, %arg1, %c0_i32_12 : i32
    %20 = arith.extui %19 : i1 to i32
    %c0_i32_13 = arith.constant 0 : i32
    %21 = arith.cmpi ne, %20, %c0_i32_13 : i32
    scf.if %21 {
      %c0_14 = arith.constant 0 : index
      %c0_15 = arith.constant 0 : index
      %22 = vector.load %arg7[%c0_14, %c0_15] : memref<8x512xf32, #tpu.memory_space<vmem>>, vector<8x512xf32>
      %cst_16 = arith.constant 1.250000e-01 : f32
      %23 = vector.broadcast %cst_16 : f32 to vector<8x512xf32>
      %24 = arith.mulf %22, %23 : vector<8x512xf32>
      %c0_17 = arith.constant 0 : index
      %c0_18 = arith.constant 0 : index
      %25 = vector.load %arg7[%c0_17, %c0_18] : memref<8x512xf32, #tpu.memory_space<vmem>>, vector<8x512xf32>
      tpu.vector_store %arg7[%c0_17, %c0_18], %24 {strides = array<i32>} : memref<8x512xf32, #tpu.memory_space<vmem>>, vector<8x512xf32>,
      %c0_19 = arith.constant 0 : index
      %c0_20 = arith.constant 0 : index
      %26 = vector.load %arg5[%c0_19, %c0_20] : memref<512x128xf32, #tpu.memory_space<vmem>>, vector<512x128xf32>
      %cst_21 = arith.constant dense<0.000000e+00> : vector<8x128xf32>
      %27 = tpu.matmul %24, %26, %cst_21 {dimension_numbers = #tpu.dot_dimension_numbers<[1], [0], [0], [1], [0, 0, 1, 1], [], []>} : vector<8x512xf32>, vector<512x128xf32>, vector<8x128xf32> -> vector<8x128xf32>
      %c0_22 = arith.constant 0 : index
      %c0_23 = arith.constant 0 : index
      %28 = vector.load %arg6[%c0_22, %c0_23] : memref<1x128xf32, #tpu.memory_space<vmem>>, vector<1x128xf32>
      %29 = vector.broadcast %28 : vector<1x128xf32> to vector<8x128xf32>
      %30 = arith.addf %27, %29 : vector<8x128xf32>
      %c0_24 = arith.constant 0 : index
      %c0_25 = arith.constant 0 : index
      %31 = vector.load %arg8[%c0_24, %c0_25] : memref<8x128xf32, #tpu.memory_space<vmem>>, vector<8x128xf32>
      tpu.vector_store %arg8[%c0_24, %c0_25], %30 {strides = array<i32>} : memref<8x128xf32, #tpu.memory_space<vmem>>, vector<8x128xf32>,
    } else {
    }
    return
  }
  func.func @transform_0(%arg0: i32, %arg1: i32) -> (i32, i32, i32) {
    %c0_i32 = arith.constant 0 : i32
    %c0_i32_0 = arith.constant 0 : i32
    return %arg0, %arg1, %c0_i32 : i32, i32, i32
  }
  func.func @transform_1(%arg0: i32, %arg1: i32) -> (i32, i32) {
    %c0_i32 = arith.constant 0 : i32
    %c0_i32_0 = arith.constant 0 : i32
    %c0_i32_1 = arith.constant 0 : i32
    return %c0_i32, %c0_i32_0 : i32, i32
  }
  func.func @transform_2(%arg0: i32, %arg1: i32) -> (i32, i32) {
    %c0_i32 = arith.constant 0 : i32
    %c0_i32_0 = arith.constant 0 : i32
    %c0_i32_1 = arith.constant 0 : i32
    return %c0_i32, %c0_i32_0 : i32, i32
  }
  func.func @transform_3(%arg0: i32, %arg1: i32) -> (i32, i32) {
    %c0_i32 = arith.constant 0 : i32
    %c0_i32_0 = arith.constant 0 : i32
    %c0_i32_1 = arith.constant 0 : i32
    return %c0_i32, %c0_i32_0 : i32, i32
  }
  func.func @transform_4(%arg0: i32, %arg1: i32) -> (i32, i32) {
    %c0_i32 = arith.constant 0 : i32
    %c0_i32_0 = arith.constant 0 : i32
    %c0_i32_1 = arith.constant 0 : i32
    return %c0_i32, %c0_i32_0 : i32, i32
  }
  func.func @transform_5(%arg0: i32, %arg1: i32) -> (i32, i32) {
    %c0_i32 = arith.constant 0 : i32
    %c0_i32_0 = arith.constant 0 : i32
    return %arg0, %c0_i32 : i32, i32
  }
  func.func @transform_6(%arg0: i32, %arg1: i32) -> (i32, i32) {
    %c0_i32 = arith.constant 0 : i32
    %c0_i32_0 = arith.constant 0 : i32
    return %arg0, %c0_i32 : i32, i32
  }
}

</mosaic_0001>

<bundles_post_ra>
// kernel: tpu_custom_call.1
= control target key start
LH: loop header
LB: loop body
LE: loop exit
PB: predicated region body
PF: predicated region fallthrough
CT: control target
= control target key end

     0   :  { %12 = vsyncpa [#allocation3], 0  ;;  %s1476_s0 = inlined_call_operand.hbm [shape: f32[8,8,32], index: 0, kind: input, shape index: {}]   ;;  %s1477_s1 = inlined_call_operand.hbm [shape: bf16[32,512], index: 1, kind: input, shape index: {}]   ;;  %s1478_s2 = inlined_call_operand.hbm [shape: f32[1,512], index: 2, kind: input, shape index: {}]   ;;  %s1479_s3 = inlined_call_operand.hbm [shape: f32[512,128], index: 3, kind: input, shape index: {}]   ;;  %s1480_s4 = inlined_call_operand.vmem [shape: f32[1,128], index: 4, kind: input, shape index: {}]   ;;  %s1481_s5 = inlined_call_operand.hbm [shape: f32[8,512], index: 5, kind: output, shape index: {0}]   ;;  %s1482_s6 = inlined_call_operand.hbm [shape: f32[8,128], index: 6, kind: output, shape index: {1}]  }
   0x1   :  { %13 = vsyncpa [#allocation6], 0 }
   0x2   :  { %14 = vsyncpa [#allocation9], 0 }
   0x3   :  { %15 = vsyncpa [#allocation4], 0 }
   0x4   :  { %16 = vsyncpa [#allocation12], 0  ;;  %s1293_s21 = smov [#allocation5]  }
   0x5   :  { %s34_s22 = sshll.u32 %s1293_s21, 4  ;;  %s35_s22 = int_to_ptr.vmem [resolvable:$true] %s34_s22 }
   0x6   :  { %s1171_s23 = scalar_lea.vmem %s35_s22, 1024  ;;  %p1176_p1 = scmp.lt.s32.totalorder %s35_s22, %s35_s22 }
   0x7   :  { %p1172_p0 = scmp.ne.s32.totalorder %s35_s22, %s1171_s23  ;;  %p1177_p2 = scmp.lt.s32.totalorder %s1171_s23, %s1171_s23 }
   0x9   :  { %p1178_p3 = por %p1177_p2, %p1176_p1 }
   0xb   :  { %p1179_p4 = pnand %p1178_p3, %p1172_p0 }
   0xd   :  { %1182 = shalt.err (!%p1179_p4)
}
   0xe   :  { %s1294_s24 = smov 256   ;;  %s1295_s25 = smov 16  }
   0xf   :  { %40 = dma.hbm_to_vmem [thread:$0]  %s1477_s1, 1024, %s35_s22, [#allocation6], %s1294_s24, %s1294_s24, %s1295_s25  }
  0x10   :  { %s1296_s28 = smov [#allocation2]  }
  0x11   :  { %s22_s29 = sshll.u32 %s1296_s28, 4  ;;  %s23_s29 = int_to_ptr.vmem [resolvable:$true] %s22_s29 }
  0x12   :  { %s1191_s30 = scalar_lea.vmem %s23_s29, 1024  ;;  %p1196_p6 = scmp.lt.s32.totalorder %s23_s29, %s23_s29 }
  0x13   :  { %p1192_p5 = scmp.ne.s32.totalorder %s23_s29, %s1191_s30  ;;  %p1197_p7 = scmp.lt.s32.totalorder %s1191_s30, %s1191_s30 }
  0x15   :  { %p1198_p8 = por %p1197_p7, %p1196_p6 }
  0x17   :  { %p1199_p9 = pnand %p1198_p8, %p1192_p5 }
  0x19   :  { %1202 = shalt.err (!%p1199_p9)
}
  0x1a   :  { %s1297_s7 = smov 128   ;;  %s1298_s8 = smov 8  }
  0x1b   :  { %28 = dma.hbm_to_vmem [thread:$0]  %s1476_s0, 1024, %s23_s29, [#allocation3], %s1297_s7, %s1297_s7, %s1298_s8  }
  0x1c   :  { %s1299_s11 = smov [#allocation7]   ;;  %s1300_s13 = smov [#allocation8]  }
  0x1d   :  { %s47_s12 = sshll.u32 %s1299_s11, 4  ;;  %s56_s1 = sshll.u32 %s1300_s13, 4  ;;  %s48_s12 = int_to_ptr.vmem [resolvable:$true] %s47_s12  ;;  %s57_s1 = int_to_ptr.vmem [resolvable:$true] %s56_s1 }
  0x1e   :  { %s1211_s14 = scalar_lea.vmem %s48_s12, 64  ;;  %p1216_p11 = scmp.lt.s32.totalorder %s48_s12, %s48_s12 }
  0x1f   :  { %p1212_p10 = scmp.ne.s32.totalorder %s48_s12, %s1211_s14  ;;  %p1217_p12 = scmp.lt.s32.totalorder %s1211_s14, %s1211_s14 }
  0x21   :  { %p1218_p13 = por %p1217_p12, %p1216_p11 }
  0x23   :  { %p1219_p0 = pnand %p1218_p13, %p1212_p10 }
  0x25   :  { %1222 = shalt.err (!%p1219_p0)
}
  0x26   :  { %50 = dma.hbm_to_vmem [thread:$0]  %s1478_s2, 64, %s48_s12, [#allocation6]  }
  0x27   :  { %s1231_s17 = scalar_lea.vmem %s57_s1, 8192  ;;  %p1236_p2 = scmp.lt.s32.totalorder %s57_s1, %s57_s1 }
  0x28   :  { %p1232_p1 = scmp.ne.s32.totalorder %s57_s1, %s1231_s17  ;;  %p1237_p3 = scmp.lt.s32.totalorder %s1231_s17, %s1231_s17 }
  0x2a   :  { %p1238_p4 = por %p1237_p3, %p1236_p2 }
  0x2c   :  { %p1239_p5 = pnand %p1238_p4, %p1232_p1 }
  0x2e   :  { %1242 = shalt.err (!%p1239_p5)
}
  0x2f   :  { %62 = dma.hbm_to_vmem [thread:$0]  %s1479_s3, 8192, %s57_s1, [#allocation9], %s1297_s7, %s1297_s7, %s1298_s8  }
  0x30   :  { %1283 = dma.done.wait [#allocation3], 1024  }
  0x31   :  { %1284 = vsyncadd [#allocation3], 4294966272 }
  0x32   :  { %1285 = dma.done.wait [#allocation6], 1088  }
  0x33   :  { %1286 = vsyncadd [#allocation6], 4294966208 }
  0x34   :  { %1287 = dma.done.wait [#allocation9], 8192  }
  0x35   :  { %1288 = vsyncadd [#allocation9], 4294959104  ;;  %v1301_v0 = vmov 0   ;;  %v1119_v1 = vld [vmem:[#allocation5 + $0x24] ss:$16 sps:$4 sm:$0xff]   ;;  %v87_v10 = vld [vmem:[#allocation2 + $0x8] sm:$0xff] }
  0x36   :  { %213 = vmatprep.mubr.bf16.mxu0 %v1301_v0  ;;  %286 = vmatprep.mubr.bf16.mxu1 %v1301_v0  ;;  %v1121_v2 = vld [vmem:[#allocation5 + $0x2c] ss:$16 sps:$4 sm:$0xff]   ;;  %v1123_v3 = vld [vmem:[#allocation5 + $0x20] ss:$16 sps:$4 sm:$0xff]   ;;  %v1124_v4 = vld [vmem:[#allocation5 + $0x28] ss:$16 sps:$4 sm:$0xff]  }
  0x37   :  { %193 = vmatprep.subr.bf16.mxu0 %v1119_v1  ;;  %266 = vmatprep.subr.bf16.mxu1 %v1121_v2  ;;  %v1125_v5 = vld [vmem:[#allocation5 + $0x4] ss:$16 sps:$4 sm:$0xff]   ;;  %v1127_v6 = vld [vmem:[#allocation5 + $0xc] ss:$16 sps:$4 sm:$0xff]   ;;  %v1129_v7 = vld [vmem:[#allocation5] ss:$16 sps:$4 sm:$0xff]  }
  0x38   :  { %194 = vmatpush1.bf16.msra.mxu0 %v1123_v3  ;;  %267 = vmatpush1.bf16.msra.mxu1 %v1124_v4  ;;  %v1130_v8 = vld [vmem:[#allocation5 + $0x8] ss:$16 sps:$4 sm:$0xff]   ;;  %v86_v9 = vld [vmem:[#allocation2] sm:$0xff]  ;;  %vm168_vm0 = vcmask 261120   ;;  %v88_v12 = vld [vmem:[#allocation2 + $0x10] sm:$0xff]  ;;  %vm699_vm1 = vcmask 1041409  }
  0x39   :  { %195 = vmatprep.subr.bf16.mxu0 %v1125_v5  ;;  %268 = vmatprep.subr.bf16.mxu1 %v1127_v6  ;;  %v94_v11 = vpack.c.bf16 %v87_v10, %v86_v9  ;;  %v89_v13 = vld [vmem:[#allocation2 + $0x18] sm:$0xff]  ;;  %v90_v15 = vld [vmem:[#allocation2 + $0x20] sm:$0xff]  ;;  %v91_v16 = vld [vmem:[#allocation2 + $0x28] sm:$0xff]  ;;  %vm701_vm2 = vcmask 1042434   ;;  %vm703_vm3 = vcmask 1043459   ;;  %vm705_vm4 = vcmask 1044484  }
  0x3a   :  { %v95_v14 = vpack.c.bf16 %v89_v13, %v88_v12  ;;  %v96_v17 = vpack.c.bf16 %v91_v16, %v90_v15  ;;  %v92_v18 = vld [vmem:[#allocation2 + $0x30] sm:$0xff]  ;;  %v93_v19 = vld [vmem:[#allocation2 + $0x38] sm:$0xff]  ;;  %v789_v33 = vld [vmem:[#allocation8 + $0xe0] sm:$0xff]  ;;  %vm707_vm5 = vcmask 1045509   ;;  %vm709_vm6 = vcmask 1046534   ;;  %s1302_s2 = smov [#allocation10]  }
  0x3b   :  { %v97_v20 = vpack.c.bf16 %v93_v19, %v92_v18  ;;  %v792_v21 = vld [vmem:[#allocation8 + $0xf8] sm:$0xff]  ;;  %v791_v25 = vld [vmem:[#allocation8 + $0xf0] sm:$0xff]  ;;  %v790_v29 = vld [vmem:[#allocation8 + $0xe8] sm:$0xff]  ;;  %vm711_vm7 = vcmask 1047559   ;;  %s979_s3 = sshll.u32 %s1302_s2, 4  ;;  %s980_s3 = int_to_ptr.vmem [resolvable:$true] %s979_s3 }
  0x3c   :  { %196 = vmatpush1.bf16.msra.mxu0 %v1129_v7  ;;  %269 = vmatpush1.bf16.msra.mxu1 %v1130_v8  ;;  %v824_v22 = vld [vmem:[#allocation8 + $0x1f8] sm:$0xff]  ;;  %v823_v26 = vld [vmem:[#allocation8 + $0x1f0] sm:$0xff]  ;;  %v822_v30 = vld [vmem:[#allocation8 + $0x1e8] sm:$0xff]  ;;  %s1243_s19 = scalar_lea.vmem %s980_s3, 512  ;;  %p1248_p7 = scmp.lt.s32.totalorder %s980_s3, %s980_s3 }
  0x3d   :  { %1037 = vmatprep.subr.mxu0 %v792_v21  ;;  %v776_v23 = vld [vmem:[#allocation8 + $0x78] sm:$0xff]  ;;  %1072 = vmatprep.subr.mxu1 %v824_v22  ;;  %v775_v27 = vld [vmem:[#allocation8 + $0x70] sm:$0xff]  ;;  %v774_v31 = vld [vmem:[#allocation8 + $0x68] sm:$0xff]  ;;  %v108_v21 = vlaneseq  ;;  %p1244_p6 = scmp.ne.s32.totalorder %s980_s3, %s1243_s19  ;;  %p1249_p8 = scmp.lt.s32.totalorder %s1243_s19, %s1243_s19 }
  0x3e   :  { %v808_v24 = vld [vmem:[#allocation8 + $0x178] sm:$0xff]  ;;  %v807_v28 = vld [vmem:[#allocation8 + $0x170] sm:$0xff]  ;;  %v806_v32 = vld [vmem:[#allocation8 + $0x168] sm:$0xff] }
  0x3f   :  { %1012 = vmatmul.mubr.msk.bf16.vlgmr.msra.gmra.mxu0 %vm168_vm0, %v94_v11  ;;  %1016 = vmatmul.mubr.msk.bf16.vlgmr.msra.gmra.mxu1 %vm168_vm0, %v94_v11  ;;  %v821_v34 = vld [vmem:[#allocation8 + $0x1e0] sm:$0xff]  ;;  %v788_v37 = vld [vmem:[#allocation8 + $0xd8] sm:$0xff]  ;;  %v787_v41 = vld [vmem:[#allocation8 + $0xd0] sm:$0xff]  ;;  %v109_v22 = vshrl.u32 %v108_v21, 7  ;;  %p1250_p9 = por %p1249_p8, %p1248_p7 }
  0x40   :  { %223 = vmatprep.mubr.bf16.mxu0 %v1301_v0  ;;  %296 = vmatprep.mubr.bf16.mxu1 %v1301_v0  ;;  %v773_v35 = vld [vmem:[#allocation8 + $0x60] sm:$0xff]  ;;  %v820_v38 = vld [vmem:[#allocation8 + $0x1d8] sm:$0xff]  ;;  %v819_v42 = vld [vmem:[#allocation8 + $0x1d0] sm:$0xff] }
  0x41   :  { %1038 = vmatpush3.msra.mxu0 %v776_v23  ;;  %1073 = vmatpush3.msra.mxu1 %v808_v24  ;;  %v805_v36 = vld [vmem:[#allocation8 + $0x160] sm:$0xff]  ;;  %v772_v39 = vld [vmem:[#allocation8 + $0x58] sm:$0xff]  ;;  %v771_v43 = vld [vmem:[#allocation8 + $0x50] sm:$0xff]  ;;  %v110_v23 = vsub.s32 0, %v109_v22  ;;  %p1251_p10 = pnand %p1250_p9, %p1244_p6 }
  0x42   :  { %1039 = vmatprep.subr.mxu0 %v791_v25  ;;  %1074 = vmatprep.subr.mxu1 %v823_v26  ;;  %v804_v40 = vld [vmem:[#allocation8 + $0x158] sm:$0xff]  ;;  %v803_v44 = vld [vmem:[#allocation8 + $0x150] sm:$0xff]  ;;  %v786_v45 = vld [vmem:[#allocation8 + $0xc8] sm:$0xff]  ;;  %v118_v25 = vsub.s32 2, %v109_v22  ;;  %v114_v26 = vsub.s32 1, %v109_v22 }
  0x43   :  { %1040 = vmatpush3.msra.mxu0 %v775_v27  ;;  %1075 = vmatpush3.msra.mxu1 %v807_v28  ;;  %v818_v46 = vld [vmem:[#allocation8 + $0x1c8] sm:$0xff]  ;;  %v785_v49 = vld [vmem:[#allocation8 + $0xc0] sm:$0xff]  ;;  %v784_v53 = vld [vmem:[#allocation8 + $0xb8] sm:$0xff]  ;;  %v122_v27 = vsub.s32 3, %v109_v22 }
  0x44   :  { %1041 = vmatprep.subr.mxu0 %v790_v29  ;;  %1076 = vmatprep.subr.mxu1 %v822_v30  ;;  %v770_v47 = vld [vmem:[#allocation8 + $0x48] sm:$0xff]  ;;  %v817_v50 = vld [vmem:[#allocation8 + $0x1c0] sm:$0xff]  ;;  %v816_v54 = vld [vmem:[#allocation8 + $0x1b8] sm:$0xff] }
  0x45   :  { %1042 = vmatpush3.msra.mxu0 %v774_v31  ;;  %1077 = vmatpush3.msra.mxu1 %v806_v32  ;;  %v802_v48 = vld [vmem:[#allocation8 + $0x148] sm:$0xff]  ;;  %v769_v51 = vld [vmem:[#allocation8 + $0x40] sm:$0xff]  ;;  %v768_v55 = vld [vmem:[#allocation8 + $0x38] sm:$0xff] }
  0x46   :  { %1043 = vmatprep.subr.mxu0 %v789_v33  ;;  %1078 = vmatprep.subr.mxu1 %v821_v34  ;;  %v801_v52 = vld [vmem:[#allocation8 + $0x140] sm:$0xff]  ;;  %v800_v56 = vld [vmem:[#allocation8 + $0x138] sm:$0xff]  ;;  %v783_v57 = vld [vmem:[#allocation8 + $0xb0] sm:$0xff] }
  0x47   :  { %1013 = vmatmul.mubr.msk.bf16.gmra.mxu0 %vm168_vm0, %v95_v14  ;;  %1017 = vmatmul.mubr.msk.bf16.gmra.mxu1 %vm168_vm0, %v95_v14  ;;  %v815_v58 = vld [vmem:[#allocation8 + $0x1b0] sm:$0xff]  ;;  %v782_v61 = vld [vmem:[#allocation8 + $0xa8] sm:$0xff]  ;;  %v781_v1 = vld [vmem:[#allocation8 + $0xa0] sm:$0xff] }
  0x48   :  { %233 = vmatprep.mubr.bf16.mxu0 %v1301_v0  ;;  %306 = vmatprep.mubr.bf16.mxu1 %v1301_v0  ;;  %v767_v59 = vld [vmem:[#allocation8 + $0x30] sm:$0xff]  ;;  %v814_v62 = vld [vmem:[#allocation8 + $0x1a8] sm:$0xff]  ;;  %v813_v2 = vld [vmem:[#allocation8 + $0x1a0] sm:$0xff] }
  0x49   :  { %1044 = vmatpush3.msra.mxu0 %v773_v35  ;;  %1079 = vmatpush3.msra.mxu1 %v805_v36  ;;  %v799_v60 = vld [vmem:[#allocation8 + $0x130] sm:$0xff]  ;;  %v766_v63 = vld [vmem:[#allocation8 + $0x28] sm:$0xff]  ;;  %v765_v3 = vld [vmem:[#allocation8 + $0x20] sm:$0xff] }
  0x4a   :  { %1045 = vmatprep.subr.mxu0 %v788_v37  ;;  %1080 = vmatprep.subr.mxu1 %v820_v38  ;;  %v797_v4 = vld [vmem:[#allocation8 + $0x120] sm:$0xff]  ;;  %v780_v5 = vld [vmem:[#allocation8 + $0x98] sm:$0xff]  ;;  %v779_v9 = vld [vmem:[#allocation8 + $0x90] sm:$0xff] }
  0x4b   :  { %1046 = vmatpush3.msra.mxu0 %v772_v39  ;;  %1081 = vmatpush3.msra.mxu1 %v804_v40  ;;  %v812_v6 = vld [vmem:[#allocation8 + $0x198] sm:$0xff]  ;;  %v811_v10 = vld [vmem:[#allocation8 + $0x190] sm:$0xff]  ;;  %v778_v12 = vld [vmem:[#allocation8 + $0x88] sm:$0xff] }
  0x4c   :  { %1047 = vmatprep.subr.mxu0 %v787_v41  ;;  %1082 = vmatprep.subr.mxu1 %v819_v42  ;;  %v764_v7 = vld [vmem:[#allocation8 + $0x18] sm:$0xff]  ;;  %v763_v11 = vld [vmem:[#allocation8 + $0x10] sm:$0xff]  ;;  %v762_v14 = vld [vmem:[#allocation8 + $0x8] sm:$0xff] }
  0x4d   :  { %1048 = vmatpush3.msra.mxu0 %v771_v43  ;;  %1083 = vmatpush3.msra.mxu1 %v803_v44  ;;  %v796_v8 = vld [vmem:[#allocation8 + $0x118] sm:$0xff]  ;;  %v795_v13 = vld [vmem:[#allocation8 + $0x110] sm:$0xff]  ;;  %v810_v15 = vld [vmem:[#allocation8 + $0x188] sm:$0xff] }
  0x4e   :  { %1049 = vmatprep.subr.mxu0 %v786_v45  ;;  %1084 = vmatprep.subr.mxu1 %v818_v46  ;;  %v777_v16 = vld [vmem:[#allocation8 + $0x80] sm:$0xff]  ;;  %v106_v24 = vld [vmem:[#allocation7] sm:$0xf] }
  0x4f   :  { %1014 = vmatmul.mubr.msk.bf16.gmra.mxu0 %vm168_vm0, %v96_v17  ;;  %1018 = vmatmul.mubr.msk.bf16.gmra.mxu1 %vm168_vm0, %v96_v17  ;;  %v794_v17 = vld [vmem:[#allocation8 + $0x108] sm:$0xff]  ;;  %v761_v18 = vld [vmem:[#allocation8] sm:$0xff]  ;;  %v1359_v30 = vrot.slane %v106_v24, %v110_v23  ;;  %v1361_v31 = vrot.slane %v106_v24, %v118_v25  ;;  %v1363_v32 = vrot.slane %v106_v24, %v114_v26 }
  0x50   :  { %243 = vmatprep.mubr.bf16.mxu0 %v1301_v0  ;;  %316 = vmatprep.mubr.bf16.mxu1 %v1301_v0  ;;  %v798_v0 = vld [vmem:[#allocation8 + $0x128] sm:$0xff]  ;;  %v809_v19 = vld [vmem:[#allocation8 + $0x180] sm:$0xff]  ;;  %v1365_v35 = vrot.slane %v106_v24, %v122_v27 }
  0x51   :  { %1050 = vmatpush3.msra.mxu0 %v770_v47  ;;  %1085 = vmatpush3.msra.mxu1 %v802_v48 }
  0x52   :  { %1051 = vmatprep.subr.mxu0 %v785_v49  ;;  %1086 = vmatprep.subr.mxu1 %v817_v50 }
  0x53   :  { %1052 = vmatpush3.msra.mxu0 %v769_v51  ;;  %1087 = vmatpush3.msra.mxu1 %v801_v52 }
  0x54   :  { %1053 = vmatprep.subr.mxu0 %v784_v53  ;;  %1088 = vmatprep.subr.mxu1 %v816_v54 }
  0x55   :  { %1054 = vmatpush3.msra.mxu0 %v768_v55  ;;  %1089 = vmatpush3.msra.mxu1 %v800_v56 }
  0x56   :  { %1055 = vmatprep.subr.mxu0 %v783_v57  ;;  %1090 = vmatprep.subr.mxu1 %v815_v58 }
  0x57   :  { %1015 = vmatmul.mubr.msk.bf16.gmra.mxu0 %vm168_vm0, %v97_v20  ;;  %1019 = vmatmul.mubr.msk.bf16.gmra.mxu1 %vm168_vm0, %v97_v20  ;;  %v793_v20 = vld [vmem:[#allocation8 + $0x100] sm:$0xff] }
  0x58   :  { %1056 = vmatpush3.msra.mxu0 %v767_v59  ;;  %1091 = vmatpush3.msra.mxu1 %v799_v60 }
  0x59   :  { %1057 = vmatprep.subr.mxu0 %v782_v61  ;;  %1092 = vmatprep.subr.mxu1 %v814_v62 }
  0x5a   :  { %1058 = vmatpush3.msra.mxu0 %v766_v63  ;;  %1093 = vmatpush3.msra.mxu1 %v798_v0 }
  0x5b   :  { %1059 = vmatprep.subr.mxu0 %v781_v1  ;;  %1094 = vmatprep.subr.mxu1 %v813_v2 }
  0x5c   :  { %1060 = vmatpush3.msra.mxu0 %v765_v3  ;;  %1095 = vmatpush3.msra.mxu1 %v797_v4 }
  0x5d   :  { %1061 = vmatprep.subr.mxu0 %v780_v5  ;;  %1096 = vmatprep.subr.mxu1 %v812_v6 }
  0x5e   :  { %1062 = vmatpush3.msra.mxu0 %v764_v7  ;;  %1097 = vmatpush3.msra.mxu1 %v796_v8 }
  0x5f   :  { %1063 = vmatprep.subr.mxu0 %v779_v9  ;;  %1098 = vmatprep.subr.mxu1 %v811_v10 }
  0x60   :  { %1064 = vmatpush3.msra.mxu0 %v763_v11  ;;  %1099 = vmatpush3.msra.mxu1 %v795_v13 }
  0x61   :  { %1065 = vmatprep.subr.mxu0 %v778_v12  ;;  %1100 = vmatprep.subr.mxu1 %v810_v15 }
  0x62   :  { %1066 = vmatpush3.msra.mxu0 %v762_v14  ;;  %1101 = vmatpush3.msra.mxu1 %v794_v17 }
  0x63   :  { %1067 = vmatprep.subr.mxu0 %v777_v16  ;;  %1102 = vmatprep.subr.mxu1 %v809_v19 }
  0x64   :  { %1068 = vmatpush3.msra.mxu0 %v761_v18  ;;  %1103 = vmatpush3.msra.mxu1 %v793_v20 }
  0xff   :  { %v215_v28 = vpop.f32.mrf.mxu0  ;;  %v288_v29 = vpop.f32.mrf.mxu1 }
 0x100   :  { %v216_v38 = vadd.f32 %v215_v28, %v1359_v30  ;;  %v289_v41 = vadd.f32 %v288_v29, %v1361_v31 }
 0x101   :  { %v217_v33 = vpop.f32.mrf.mxu0  ;;  %v290_v34 = vpop.f32.mrf.mxu1 }
 0x102   :  { %v218_v42 = vadd.f32 %v217_v33, %v1363_v32  ;;  %v291_v45 = vadd.f32 %v290_v34, %v1365_v35 }
 0x103   :  { %v219_v36 = vpop.f32.mrf.mxu0  ;;  %v292_v37 = vpop.f32.mrf.mxu1 }
 0x104   :  { %v220_v39 = vadd.f32 %v219_v36, %v1359_v30  ;;  %v293_v40 = vadd.f32 %v292_v37, %v1361_v31 }
 0x105   :  { %v221_v43 = vpop.f32.mrf.mxu0  ;;  %v294_v44 = vpop.f32.mrf.mxu1 }
 0x106   :  { %v327_v46 = vpack.c.bf16 %v220_v39, %v216_v38  ;;  %v222_v47 = vadd.f32 %v221_v43, %v1363_v32  ;;  %v295_v48 = vadd.f32 %v294_v44, %v1365_v35  ;;  %v329_v51 = vpack.c.bf16 %v293_v40, %v289_v41 }
 0x107   :  { %v225_v49 = vpop.f32.mrf.mxu0  ;;  %v298_v50 = vpop.f32.mrf.mxu1 }
 0x108   :  { %v328_v52 = vpack.c.bf16 %v222_v47, %v218_v42  ;;  %v330_v53 = vpack.c.bf16 %v295_v48, %v291_v45  ;;  %1131 = vtanh.bf16 %v327_v46  ;;  %v226_v3 = vadd.f32 %v225_v49, %v1359_v30 }
 0x109   :  { %v227_v54 = vpop.f32.mrf.mxu0  ;;  %v300_v55 = vpop.f32.mrf.mxu1  ;;  %v299_v6 = vadd.f32 %v298_v50, %v1361_v31 }
 0x10a   :  { %1133 = vtanh.bf16 %v328_v52  ;;  %v228_v63 = vadd.f32 %v227_v54, %v1363_v32  ;;  %v301_v1 = vadd.f32 %v300_v55, %v1365_v35 }
 0x10b   :  { %1135 = vtanh.bf16 %v330_v53  ;;  %v229_v56 = vpop.f32.mrf.mxu0  ;;  %v302_v57 = vpop.f32.mrf.mxu1 }
 0x10c   :  { %1137 = vtanh.bf16 %v329_v51  ;;  %v230_v0 = vadd.f32 %v229_v56, %v1359_v30  ;;  %v303_v2 = vadd.f32 %v302_v57, %v1361_v31 }
 0x10d   :  { %v231_v58 = vpop.f32.mrf.mxu0  ;;  %v304_v59 = vpop.f32.mrf.mxu1 }
 0x10e   :  { %v232_v60 = vadd.f32 %v231_v58, %v1363_v32  ;;  %v305_v62 = vadd.f32 %v304_v59, %v1365_v35  ;;  %v331_v9 = vpack.c.bf16 %v230_v0, %v226_v3  ;;  %v333_v12 = vpack.c.bf16 %v303_v2, %v299_v6 }
 0x10f   :  { %v235_v61 = vpop.f32.mrf.mxu0  ;;  %v308_v10 = vpop.f32.mrf.mxu1 }
 0x110   :  { %v332_v4 = vpack.c.bf16 %v232_v60, %v228_v63  ;;  %v334_v7 = vpack.c.bf16 %v305_v62, %v301_v1  ;;  %v236_v40 = vadd.f32 %v235_v61, %v1359_v30  ;;  %v309_v44 = vadd.f32 %v308_v10, %v1361_v31 }
 0x111   :  { %v237_v5 = vpop.f32.mrf.mxu0  ;;  %v310_v19 = vpop.f32.mrf.mxu1 }
 0x112   :  { %1139 = vtanh.bf16 %v332_v4  ;;  %v238_v41 = vadd.f32 %v237_v5, %v1363_v32  ;;  %v1393_v59 = vadd.f32 %v310_v19, %v1365_v35 }
 0x113   :  { %v239_v16 = vpop.f32.mrf.mxu0  ;;  %1141 = vtanh.bf16 %v334_v7  ;;  %v312_v27 = vpop.f32.mrf.mxu1 }
 0x114   :  { %1143 = vtanh.bf16 %v331_v9  ;;  %v240_v39 = vadd.f32 %v239_v16, %v1359_v30  ;;  %v313_v45 = vadd.f32 %v312_v27, %v1361_v31 }
 0x115   :  { %1145 = vtanh.bf16 %v333_v12  ;;  %v241_v24 = vpop.f32.mrf.mxu0  ;;  %v314_v46 = vpop.f32.mrf.mxu1 }
 0x116   :  { %v1132_v8 = vpop.eup %1131  ;;  %v242_v34 = vadd.f32 %v241_v24, %v1363_v32  ;;  %v335_v54 = vpack.c.bf16 %v240_v39, %v236_v40  ;;  %v1390_v55 = vadd.f32 %v314_v46, %v1365_v35  ;;  %v337_v60 = vpack.c.bf16 %v313_v45, %v309_v44 }
 0x117   :  { %v245_v61 = vpop.f32.mrf.mxu0 }
 0x118   :  { %v1134_v11 = vpop.eup %1133  ;;  %v336_v50 = vpack.c.bf16 %v242_v34, %v238_v41  ;;  %v338_v9 = vpack.c.bf16 %v1390_v55, %v1393_v59  ;;  %v1398_v10 = vadd.f32 %v245_v61, %v1359_v30 }
 0x119   :  { %v1136_v13 = vpop.eup %1135  ;;  %v1020_v14 = vcombine.low %v1132_v8, %v1134_v11  ;;  %v1022_v15 = vcombine.high %v1132_v8, %v1134_v11 }
 0x11a   :  { %v1138_v17 = vpop.eup %1137  ;;  %1147 = vtanh.bf16 %v336_v50 }
 0x11b   :  { %v1021_v18 = vcombine.low %v1138_v17, %v1136_v13  ;;  %v1023_v20 = vcombine.high %v1138_v17, %v1136_v13  ;;  %v443_v21 = vunpack.c.l.bf16 %v1020_v14  ;;  %v444_v22 = vunpack.c.h.bf16 %v1020_v14  ;;  %v318_v14 = vpop.f32.mrf.mxu1 }
 0x11c   :  { %v447_v23 = vunpack.c.l.bf16 %v1022_v15  ;;  %v448_v25 = vunpack.c.h.bf16 %v1022_v15  ;;  %1149 = vtanh.bf16 %v335_v54  ;;  %v247_v15 = vpop.f32.mrf.mxu0  ;;  %v1401_v19 = vadd.f32 %v318_v14, %v1361_v31 }
 0x11d   :  { %v445_v26 = vunpack.c.l.bf16 %v1021_v18  ;;  %v446_v28 = vunpack.c.h.bf16 %v1021_v18  ;;  %v449_v29 = vunpack.c.l.bf16 %v1023_v20  ;;  %v450_v33 = vunpack.c.h.bf16 %v1023_v20 }
 0x11e   :  { %v475_v36 = vrot.slane %v443_v21, 4  ;;  %v481_v37 = vrot.slane %v444_v22, 4  ;;  %v499_v38 = vrot.slane %v447_v23, 4  ;;  %v505_v42 = vrot.slane %v448_v25, 4 }
 0x11f   :  { %v487_v43 = vrot.slane %v445_v26, 4  ;;  %v493_v47 = vrot.slane %v446_v28, 4  ;;  %v511_v48 = vrot.slane %v449_v29, 4  ;;  %v517_v49 = vrot.slane %v450_v33, 4 }
 0x120   :  { %v476_v51 = vadd.f32 %v475_v36, %v443_v21  ;;  %v482_v52 = vadd.f32 %v481_v37, %v444_v22  ;;  %v500_v53 = vadd.f32 %v499_v38, %v447_v23  ;;  %v1140_v56 = vpop.eup %1139  ;;  %v506_v57 = vadd.f32 %v505_v42, %v448_v25 }
 0x121   :  { %v488_v58 = vadd.f32 %v487_v43, %v445_v26  ;;  %v1142_v62 = vpop.eup %1141  ;;  %v494_v63 = vadd.f32 %v493_v47, %v446_v28  ;;  %v512_v0 = vadd.f32 %v511_v48, %v449_v29  ;;  %v518_v1 = vadd.f32 %v517_v49, %v450_v33 }
 0x122   :  { %v1144_v2 = vpop.eup %1143  ;;  %v477_v3 = vrot.slane %v476_v51, 2  ;;  %v483_v4 = vrot.slane %v482_v52, 2  ;;  %v501_v5 = vrot.slane %v500_v53, 2  ;;  %v507_v11 = vrot.slane %v506_v57, 2 }
 0x123   :  { %v1146_v6 = vpop.eup %1145  ;;  %v1024_v7 = vcombine.low %v1144_v2, %v1140_v56  ;;  %v1026_v8 = vcombine.high %v1144_v2, %v1140_v56  ;;  %v489_v12 = vrot.slane %v488_v58, 2  ;;  %1151 = vtanh.bf16 %v337_v60 }
 0x124   :  { %v1025_v13 = vcombine.low %v1146_v6, %v1142_v62  ;;  %v495_v16 = vrot.slane %v494_v63, 2  ;;  %v513_v17 = vrot.slane %v512_v0, 2  ;;  %v519_v18 = vrot.slane %v518_v1, 2 }
 0x125   :  { %v478_v20 = vadd.f32 %v477_v3, %v476_v51  ;;  %v484_v21 = vadd.f32 %v483_v4, %v482_v52  ;;  %v502_v22 = vadd.f32 %v501_v5, %v500_v53  ;;  %v1027_v23 = vcombine.high %v1146_v6, %v1142_v62 }
 0x126   :  { %v451_v24 = vunpack.c.l.bf16 %v1024_v7  ;;  %v452_v25 = vunpack.c.h.bf16 %v1024_v7  ;;  %v455_v26 = vunpack.c.l.bf16 %v1026_v8  ;;  %v1404_v27 = vadd.f32 %v247_v15, %v1363_v32 }
 0x127   :  { %v508_v28 = vadd.f32 %v507_v11, %v506_v57  ;;  %v490_v29 = vadd.f32 %v489_v12, %v488_v58  ;;  %v456_v33 = vunpack.c.h.bf16 %v1026_v8  ;;  %v453_v34 = vunpack.c.l.bf16 %v1025_v13  ;;  %v320_v8 = vpop.f32.mrf.mxu1  ;;  %v249_v11 = vpop.f32.mrf.mxu0 }
 0x128   :  { %v496_v36 = vadd.f32 %v495_v16, %v494_v63  ;;  %v514_v37 = vadd.f32 %v513_v17, %v512_v0  ;;  %v520_v38 = vadd.f32 %v519_v18, %v518_v1  ;;  %v454_v39 = vunpack.c.h.bf16 %v1025_v13  ;;  %v1148_v62 = vpop.eup %1147 }
 0x129   :  { %v479_v40 = vrot.slane %v478_v20, 1  ;;  %v485_v41 = vrot.slane %v484_v21, 1  ;;  %v503_v42 = vrot.slane %v502_v22, 1  ;;  %v457_v43 = vunpack.c.l.bf16 %v1027_v23 }
 0x12a   :  { %v523_v44 = vrot.slane %v451_v24, 4  ;;  %v529_v45 = vrot.slane %v452_v25, 4  ;;  %v547_v46 = vrot.slane %v455_v26, 4  ;;  %v458_v47 = vunpack.c.h.bf16 %v1027_v23  ;;  %v1150_v3 = vpop.eup %1149 }
 0x12b   :  { %v509_v48 = vrot.slane %v508_v28, 1  ;;  %v491_v49 = vrot.slane %v490_v29, 1  ;;  %v553_v50 = vrot.slane %v456_v33, 4  ;;  %v535_v51 = vrot.slane %v453_v34, 4 }
 0x12c   :  { %v497_v52 = vrot.slane %v496_v36, 1  ;;  %v515_v53 = vrot.slane %v514_v37, 1  ;;  %v521_v54 = vrot.slane %v520_v38, 1  ;;  %v541_v56 = vrot.slane %v454_v39, 4 }
 0x12d   :  { %v480_v57 = vadd.f32 %v479_v40, %v478_v20  ;;  %v486_v58 = vadd.f32 %v485_v41, %v484_v21  ;;  %v504_v60 = vadd.f32 %v503_v42, %v502_v22  ;;  %v559_v61 = vrot.slane %v457_v43, 4 }
 0x12e   :  { %v524_v63 = vadd.f32 %v523_v44, %v451_v24  ;;  %v530_v0 = vadd.f32 %v529_v45, %v452_v25  ;;  %v548_v1 = vadd.f32 %v547_v46, %v455_v26  ;;  %v565_v2 = vrot.slane %v458_v47, 4 }
 0x12f   :  { %v510_v4 = vadd.f32 %v509_v48, %v508_v28  ;;  %v1406_v5 = vadd.f32 %v491_v49, %v490_v29  ;;  %v554_v6 = vadd.f32 %v553_v50, %v456_v33  ;;  %v536_v7 = vadd.f32 %v535_v51, %v453_v34  ;;  %v322_v34 = vpop.f32.mrf.mxu1 }
 0x130   :  { %v1408_v12 = vadd.f32 %v497_v52, %v496_v36  ;;  %v1410_v13 = vadd.f32 %v515_v53, %v514_v37  ;;  %v1412_v14 = vadd.f32 %v521_v54, %v520_v38  ;;  %v542_v15 = vadd.f32 %v541_v56, %v454_v39  ;;  %v251_v36 = vpop.f32.mrf.mxu0 }
 0x131   :  { %v1414_v16 = vpop.eup %1151  ;;  %v1417_v17 = vsel %vm699_vm1, %v504_v60, %v480_v57  ;;  %v560_v18 = vadd.f32 %v559_v61, %v457_v43  ;;  %v1028_v20 = vcombine.low %v1150_v3, %v1148_v62  ;;  %v1030_v21 = vcombine.high %v1150_v3, %v1148_v62  ;;  %v324_v52 = vpop.f32.mrf.mxu1 }
 0x132   :  { %v525_v22 = vrot.slane %v524_v63, 2  ;;  %v531_v23 = vrot.slane %v530_v0, 2  ;;  %v549_v24 = vrot.slane %v548_v1, 2  ;;  %v566_v25 = vadd.f32 %v565_v2, %v458_v47 }
 0x133   :  { %v555_v26 = vrot.slane %v554_v6, 2  ;;  %v537_v28 = vrot.slane %v536_v7, 2  ;;  %v459_v29 = vunpack.c.l.bf16 %v1028_v20  ;;  %v460_v33 = vunpack.c.h.bf16 %v1028_v20 }
 0x134   :  { %v543_v37 = vrot.slane %v542_v15, 2  ;;  %v463_v38 = vunpack.c.l.bf16 %v1030_v21  ;;  %v464_v39 = vunpack.c.h.bf16 %v1030_v21  ;;  %1153 = vtanh.bf16 %v338_v9 }
 0x135   :  { %v561_v40 = vrot.slane %v560_v18, 2  ;;  %v571_v41 = vrot.slane %v459_v29, 4  ;;  %v577_v42 = vrot.slane %v460_v33, 4  ;;  %v250_v43 = vadd.f32 %v249_v11, %v1359_v30 }
 0x136   :  { %v713_v44 = vsel %vm699_vm1, %v510_v4, %v486_v58  ;;  %v595_v45 = vrot.slane %v463_v38, 4  ;;  %v601_v46 = vrot.slane %v464_v39, 4  ;;  %v252_v47 = vadd.f32 %v251_v36, %v1363_v32 }
 0x137   :  { %v526_v48 = vadd.f32 %v525_v22, %v524_v63  ;;  %v532_v49 = vadd.f32 %v531_v23, %v530_v0  ;;  %v567_v50 = vrot.slane %v566_v25, 2  ;;  %v339_v51 = vpack.c.bf16 %v250_v43, %v1398_v10 }
 0x138   :  { %v550_v53 = vadd.f32 %v549_v24, %v548_v1  ;;  %v572_v55 = vadd.f32 %v571_v41, %v459_v29  ;;  %v578_v59 = vadd.f32 %v577_v42, %v460_v33  ;;  %v340_v9 = vpack.c.bf16 %v252_v47, %v1404_v27 }
 0x139   :  { %v556_v54 = vadd.f32 %v555_v26, %v554_v6  ;;  %v538_v30 = vadd.f32 %v537_v28, %v536_v7  ;;  %v544_v56 = vadd.f32 %v543_v37, %v542_v15  ;;  %v562_v57 = vadd.f32 %v561_v40, %v560_v18 }
 0x13a   :  { %v596_v58 = vadd.f32 %v595_v45, %v463_v38  ;;  %v602_v60 = vadd.f32 %v601_v46, %v464_v39  ;;  %1155 = vtanh.bf16 %v339_v51  ;;  %v325_v32 = vadd.f32 %v324_v52, %v1365_v35 }
 0x13b   :  { %v527_v61 = vrot.slane %v526_v48, 1  ;;  %v533_v62 = vrot.slane %v532_v49, 1  ;;  %v568_v10 = vadd.f32 %v567_v50, %v566_v25  ;;  %1157 = vtanh.bf16 %v340_v9 }
 0x13c   :  { %v573_v63 = vrot.slane %v572_v55, 2  ;;  %v579_v0 = vrot.slane %v578_v59, 2  ;;  %v321_v1 = vadd.f32 %v320_v8, %v1365_v35  ;;  %v323_v27 = vadd.f32 %v322_v34, %v1361_v31 }
 0x13d   :  { %v551_v2 = vrot.slane %v550_v53, 1  ;;  %v557_v3 = vrot.slane %v556_v54, 1  ;;  %v539_v4 = vrot.slane %v538_v30, 1  ;;  %v545_v6 = vrot.slane %v544_v56, 1 }
 0x13e   :  { %v563_v7 = vrot.slane %v562_v57, 1  ;;  %v597_v11 = vrot.slane %v596_v58, 2  ;;  %v603_v15 = vrot.slane %v602_v60, 2  ;;  %v342_v18 = vpack.c.bf16 %v325_v32, %v321_v1 }
 0x13f   :  { %v720_v20 = vsel %vm699_vm1, %v1410_v13, %v1406_v5  ;;  %v727_v21 = vsel %vm699_vm1, %v1412_v14, %v1408_v12  ;;  %v528_v22 = vadd.f32 %v527_v61, %v526_v48  ;;  %v534_v35 = vadd.f32 %v533_v62, %v532_v49 }
 0x140   :  { %v569_v8 = vrot.slane %v568_v10, 1  ;;  %v574_v31 = vadd.f32 %v573_v63, %v572_v55  ;;  %v580_v23 = vadd.f32 %v579_v0, %v578_v59  ;;  %v341_v24 = vpack.c.bf16 %v323_v27, %v1401_v19 }
 0x141   :  { %v552_v25 = vadd.f32 %v551_v2, %v550_v53  ;;  %v558_v26 = vadd.f32 %v557_v3, %v556_v54  ;;  %v540_v28 = vadd.f32 %v539_v4, %v538_v30  ;;  %v546_v29 = vadd.f32 %v545_v6, %v544_v56 }
 0x142   :  { %v1154_v33 = vpop.eup %1153  ;;  %v1437_v34 = vadd.f32 %v563_v7, %v562_v57  ;;  %v598_v36 = vadd.f32 %v597_v11, %v596_v58  ;;  %v604_v5 = vadd.f32 %v603_v15, %v602_v60  ;;  %1159 = vtanh.bf16 %v342_v18 }
 0x143   :  { %v702_v12 = vsel %vm701_vm2, %v528_v22, %v1417_v17  ;;  %v714_v13 = vsel %vm701_vm2, %v534_v35, %v713_v44  ;;  %v1029_v14 = vcombine.low %v1414_v16, %v1154_v33  ;;  %v1031_v19 = vcombine.high %v1414_v16, %v1154_v33 }
 0x144   :  { %v570_v37 = vadd.f32 %v569_v8, %v568_v10  ;;  %v575_v38 = vrot.slane %v574_v31, 1  ;;  %v581_v39 = vrot.slane %v580_v23, 1  ;;  %1161 = vtanh.bf16 %v341_v24 }
 0x145   :  { %v461_v40 = vunpack.c.l.bf16 %v1029_v14  ;;  %v462_v41 = vunpack.c.h.bf16 %v1029_v14  ;;  %v465_v42 = vunpack.c.l.bf16 %v1031_v19  ;;  %v466_v43 = vunpack.c.h.bf16 %v1031_v19 }
 0x146   :  { %v704_v45 = vsel %vm703_vm3, %v552_v25, %v702_v12  ;;  %v715_v46 = vsel %vm703_vm3, %v558_v26, %v714_v13  ;;  %v599_v47 = vrot.slane %v598_v36, 1  ;;  %v605_v17 = vrot.slane %v604_v5, 1 }
 0x147   :  { %v583_v44 = vrot.slane %v461_v40, 4  ;;  %v589_v48 = vrot.slane %v462_v41, 4  ;;  %v607_v49 = vrot.slane %v465_v42, 4  ;;  %v613_v50 = vrot.slane %v466_v43, 4 }
 0x148   :  { %v1156_v16 = vpop.eup %1155  ;;  %v721_v51 = vsel %vm701_vm2, %v540_v28, %v720_v20  ;;  %v728_v52 = vsel %vm701_vm2, %v546_v29, %v727_v21  ;;  %v576_v53 = vadd.f32 %v575_v38, %v574_v31  ;;  %v582_v55 = vadd.f32 %v581_v39, %v580_v23 }
 0x149   :  { %v1158_v59 = vpop.eup %1157  ;;  %v584_v9 = vadd.f32 %v583_v44, %v461_v40  ;;  %v590_v54 = vadd.f32 %v589_v48, %v462_v41  ;;  %v608_v30 = vadd.f32 %v607_v49, %v465_v42  ;;  %v614_v56 = vadd.f32 %v613_v50, %v466_v43 }
 0x14a   :  { %v600_v57 = vadd.f32 %v599_v47, %v598_v36  ;;  %v606_v58 = vadd.f32 %v605_v17, %v604_v5  ;;  %v1032_v60 = vcombine.low %v1156_v16, %v1158_v59  ;;  %v1034_v32 = vcombine.high %v1156_v16, %v1158_v59 }
 0x14b   :  { %v585_v61 = vrot.slane %v584_v9, 2  ;;  %v591_v62 = vrot.slane %v590_v54, 2  ;;  %v609_v10 = vrot.slane %v608_v30, 2  ;;  %v615_v63 = vrot.slane %v614_v56, 2 }
 0x14c   :  { %v467_v0 = vunpack.c.l.bf16 %v1032_v60  ;;  %v468_v1 = vunpack.c.h.bf16 %v1032_v60  ;;  %v471_v27 = vunpack.c.l.bf16 %v1034_v32  ;;  %v472_v2 = vunpack.c.h.bf16 %v1034_v32 }
 0x14d   :  { %v706_v3 = vsel %vm705_vm4, %v576_v53, %v704_v45  ;;  %v716_v4 = vsel %vm705_vm4, %v582_v55, %v715_v46  ;;  %v586_v6 = vadd.f32 %v585_v61, %v584_v9  ;;  %v592_v7 = vadd.f32 %v591_v62, %v590_v54 }
 0x14e   :  { %v619_v11 = vrot.slane %v467_v0, 4  ;;  %v625_v15 = vrot.slane %v468_v1, 4  ;;  %v643_v18 = vrot.slane %v471_v27, 4  ;;  %v649_v20 = vrot.slane %v472_v2, 4 }
 0x14f   :  { %v587_v21 = vrot.slane %v586_v6, 1  ;;  %v593_v22 = vrot.slane %v592_v7, 1  ;;  %v610_v35 = vadd.f32 %v609_v10, %v608_v30  ;;  %v616_v8 = vadd.f32 %v615_v63, %v614_v56 }
 0x150   :  { %v1160_v31 = vpop.eup %1159  ;;  %v620_v23 = vadd.f32 %v619_v11, %v467_v0  ;;  %v626_v24 = vadd.f32 %v625_v15, %v468_v1  ;;  %v644_v25 = vadd.f32 %v643_v18, %v471_v27  ;;  %v650_v26 = vadd.f32 %v649_v20, %v472_v2 }
 0x151   :  { %v722_v28 = vsel %vm703_vm3, %v1437_v34, %v721_v51  ;;  %v729_v29 = vsel %vm703_vm3, %v570_v37, %v728_v52  ;;  %v708_v33 = vsel %vm707_vm5, %v600_v57, %v706_v3  ;;  %v717_v36 = vsel %vm707_vm5, %v606_v58, %v716_v4 }
 0x152   :  { %v1162_v5 = vpop.eup %1161  ;;  %v621_v12 = vrot.slane %v620_v23, 2  ;;  %v627_v13 = vrot.slane %v626_v24, 2  ;;  %v645_v14 = vrot.slane %v644_v25, 2  ;;  %v651_v19 = vrot.slane %v650_v26, 2 }
 0x153   :  { %v611_v38 = vrot.slane %v610_v35, 1  ;;  %v617_v39 = vrot.slane %v616_v8, 1  ;;  %v1033_v40 = vcombine.low %v1162_v5, %v1160_v31  ;;  %v1035_v41 = vcombine.high %v1162_v5, %v1160_v31 }
 0x154   :  { %v588_v42 = vadd.f32 %v587_v21, %v586_v6  ;;  %v594_v43 = vadd.f32 %v593_v22, %v592_v7  ;;  %v622_v45 = vadd.f32 %v621_v12, %v620_v23  ;;  %v628_v46 = vadd.f32 %v627_v13, %v626_v24 }
 0x155   :  { %v646_v34 = vadd.f32 %v645_v14, %v644_v25  ;;  %v652_v47 = vadd.f32 %v651_v19, %v650_v26  ;;  %v469_v37 = vunpack.c.l.bf16 %v1033_v40  ;;  %v470_v17 = vunpack.c.h.bf16 %v1033_v40 }
 0x156   :  { %v623_v44 = vrot.slane %v622_v45, 1  ;;  %v629_v48 = vrot.slane %v628_v46, 1  ;;  %v473_v49 = vunpack.c.l.bf16 %v1035_v41  ;;  %v474_v50 = vunpack.c.h.bf16 %v1035_v41 }
 0x157   :  { %v647_v16 = vrot.slane %v646_v34, 1  ;;  %v653_v51 = vrot.slane %v652_v47, 1  ;;  %v631_v52 = vrot.slane %v469_v37, 4  ;;  %v637_v53 = vrot.slane %v470_v17, 4 }
 0x158   :  { %v624_v55 = vadd.f32 %v623_v44, %v622_v45  ;;  %v630_v59 = vadd.f32 %v629_v48, %v628_v46  ;;  %v655_v9 = vrot.slane %v473_v49, 4  ;;  %v661_v54 = vrot.slane %v474_v50, 4 }
 0x159   :  { %v648_v30 = vadd.f32 %v647_v16, %v646_v34  ;;  %v654_v56 = vadd.f32 %v653_v51, %v652_v47  ;;  %v632_v57 = vadd.f32 %v631_v52, %v469_v37  ;;  %v638_v58 = vadd.f32 %v637_v53, %v470_v17 }
 0x15a   :  { %v710_v60 = vsel %vm709_vm6, %v624_v55, %v708_v33  ;;  %v718_v32 = vsel %vm709_vm6, %v630_v59, %v717_v36  ;;  %v656_v61 = vadd.f32 %v655_v9, %v473_v49  ;;  %v662_v62 = vadd.f32 %v661_v54, %v474_v50 }
 0x15b   :  { %v712_v10 = vsel %vm711_vm7, %v648_v30, %v710_v60  ;;  %v719_v63 = vsel %vm711_vm7, %v654_v56, %v718_v32  ;;  %v633_v0 = vrot.slane %v632_v57, 2  ;;  %v639_v1 = vrot.slane %v638_v58, 2 }
 0x15c   :  { %v657_v27 = vrot.slane %v656_v61, 2  ;;  %v663_v2 = vrot.slane %v662_v62, 2  ;;  %v612_v3 = vadd.f32 %v611_v38, %v610_v35  ;;  %v618_v4 = vadd.f32 %v617_v39, %v616_v8 }
 0x15d   :  { %v634_v6 = vadd.f32 %v633_v0, %v632_v57  ;;  %v640_v7 = vadd.f32 %v639_v1, %v638_v58  ;;  %v754_v18 = vmul.f32 0.125, %v719_v63  ;;  %v753_v20 = vmul.f32 0.125, %v712_v10 }
 0x15e   :  { %v658_v11 = vadd.f32 %v657_v27, %v656_v61  ;;  %v664_v15 = vadd.f32 %v663_v2, %v662_v62  ;;  %v723_v21 = vsel %vm705_vm4, %v588_v42, %v722_v28  ;;  %v730_v22 = vsel %vm705_vm4, %v594_v43, %v729_v29 }
 0x15f   :  { %v635_v31 = vrot.slane %v634_v6, 1  ;;  %v641_v23 = vrot.slane %v640_v7, 1  ;;  %896 = vmatprep.mubr.f32.mxu0 %v754_v18  ;;  %758 = vst [vmem:[#allocation10 + $0x8] sm:$0xff] %v754_v18  ;;  %757 = vst [vmem:[#allocation10] sm:$0xff] %v753_v20  ;;  %v724_v8 = vsel %vm707_vm5, %v612_v3, %v723_v21  ;;  %v731_v33 = vsel %vm707_vm5, %v618_v4, %v730_v22 }
 0x160   :  { %v659_v24 = vrot.slane %v658_v11, 1  ;;  %v665_v25 = vrot.slane %v664_v15, 1  ;;  %897 = vmatmul.mubr.f32.vlgmr.msra.gmra.mxu0 %v753_v20 }
 0x161   :  { %v636_v26 = vadd.f32 %v635_v31, %v634_v6  ;;  %v642_v35 = vadd.f32 %v641_v23, %v640_v7 }
 0x162   :  { %v660_v36 = vadd.f32 %v659_v24, %v658_v11  ;;  %v666_v5 = vadd.f32 %v665_v25, %v664_v15 }
 0x163   :  { %v725_v28 = vsel %vm709_vm6, %v636_v26, %v724_v8  ;;  %v732_v29 = vsel %vm709_vm6, %v642_v35, %v731_v33 }
 0x164   :  { %v726_v12 = vsel %vm711_vm7, %v660_v36, %v725_v28  ;;  %v733_v13 = vsel %vm711_vm7, %v666_v5, %v732_v29 }
 0x165   :  { %v756_v14 = vmul.f32 0.125, %v733_v13  ;;  %v755_v19 = vmul.f32 0.125, %v726_v12 }
 0x167   :  { %966 = vmatprep.mubr.f32.mxu1 %v756_v14  ;;  %760 = vst [vmem:[#allocation10 + $0x18] sm:$0xff] %v756_v14  ;;  %759 = vst [vmem:[#allocation10 + $0x10] sm:$0xff] %v755_v19 }
 0x168   :  { %967 = vmatmul.mubr.f32.vlgmr.msra.gmra.mxu1 %v755_v19 }
 0x169   :  { %1254 = shalt.err (!%p1251_p10)
}
 0x16a   :  { %982 = dma.vmem_to_hbm [thread:$0]  %s980_s3, 512, %s1481_s5, [#allocation4]   ;;  %v1036_v41 = vld [vmem:[%s1480_s4] ss:$0 sm:$0xff] }
 0x16b   :  { %s1303_s24 = smov [#allocation11]  }
 0x16c   :  { %s989_s25 = sshll.u32 %s1303_s24, 4  ;;  %s990_s25 = int_to_ptr.vmem [resolvable:$true] %s989_s25 }
 0x16d   :  { %s1263_s26 = scalar_lea.vmem %s990_s25, 128  ;;  %p1268_p12 = scmp.lt.s32.totalorder %s990_s25, %s990_s25 }
 0x16e   :  { %p1264_p11 = scmp.ne.s32.totalorder %s990_s25, %s1263_s26  ;;  %p1269_p13 = scmp.lt.s32.totalorder %s1263_s26, %s1263_s26 }
 0x170   :  { %p1270_p0 = por %p1269_p13, %p1268_p12 }
 0x172   :  { %p1271_p1 = pnand %p1270_p0, %p1264_p11 }
 0x220   :  { %v1069_v38 = vpop.f32.mrf.mxu0 }
 0x222   :  { %v1070_v39 = vpop.f32.mrf.mxu0 }
 0x223   :  { %v1071_v40 = vadd.f32 %v1070_v39, %v1069_v38 }
 0x225   :  { %v899_v43 = vadd.f32 %v1071_v40, %v1036_v41 }
 0x228   :  { %v1104_v42 = vpop.f32.mrf.mxu1 }
 0x22a   :  { %v1105_v45 = vpop.f32.mrf.mxu1 }
 0x22b   :  { %v1106_v46 = vadd.f32 %v1105_v45, %v1104_v42 }
 0x22d   :  { %v969_v34 = vadd.f32 %v1106_v46, %v899_v43 }
 0x22f   :  { %972 = vst [vmem:[#allocation11] sm:$0xff] %v969_v34 }
 0x230   :  { %1274 = shalt.err (!%p1271_p1)
}
 0x231   :  { %992 = dma.vmem_to_hbm [thread:$0]  %s990_s25, 128, %s1482_s6, [#allocation12]  }
 0x232   :  { %1289 = dma.done.wait [#allocation4], 512  }
 0x233   :  { %1290 = vsyncadd [#allocation4], 4294966784 }
 0x234   :  { %1291 = dma.done.wait [#allocation12], 128  }
 0x235   :  { %1292 = vsyncadd [#allocation12], 4294967168 }
 0x236   :  { %999 = vsyncpa [#allocation3], 1 }
 0x237   :  { %1000 = vsyncpa [#allocation6], 1 }
 0x238   :  { %1001 = vsyncpa [#allocation9], 1 }
 0x239   :  { %1002 = vsyncpa [#allocation4], 1 }
 0x23a   :  { %1003 = vsyncpa [#allocation12], 1 }

</bundles_post_ra>
